<compile_context>
chip_gen: v5e
topology: v5e:2x2
jax: 0.10.0
libtpu: 0.0.40
codegen_flags: <defaults>
</compile_context>

<pallas_src>
import math

import jax
import jax.numpy as jnp
from jax import lax
from jax.experimental import pallas as pl
from jax.experimental.pallas import tpu as pltpu

_INV_SQRT2 = 1.0 / math.sqrt(2.0)


# ----------------------------- Pallas kernel ---------------------------------
def _bert_intermediate_kernel(x_ref, w_ref, b_ref, o_ref):
    """Fused dense + bias + BERT-gelu on one (tm, H) x (H, tn) tile pair."""
    # x_ref: (tm, H) bf16, w_ref: (H, tn) bf16 -> f32 accumulation on the MXU.
    y = jnp.dot(x_ref[...], w_ref[...], preferred_element_type=jnp.float32)
    y = y + b_ref[...]                                    # (1, tn) f32 bias
    # BERT-exact gelu: x * 0.5 * (1 + erf(x / sqrt(2))) in f32.
    y = y * 0.5 * (1.0 + lax.erf(y * jnp.float32(_INV_SQRT2)))
    o_ref[...] = y.astype(o_ref.dtype)


# ----------------------------- wrapper ----------------------------------------
def _round_up(x, m):
    return (x + m - 1) // m * m


def _pick_col_tile(total, target, align=128):
    """Largest multiple of `align` <= target that divides `total`; else full dim."""
    if total <= target or total % align != 0:
        return total
    t = (min(target, total) // align) * align
    while t > align and total % t != 0:
        t -= align
    return t if total % t == 0 else total


def bert_intermediate(hidden_states, w, b, *, block_m=512, block_n=512,
                      out_dtype=None):
    """hidden_states: [B, S, H]; w: [H, I] (= torch weight.T); b: [I].

    out_dtype: defaults to hidden_states.dtype (f32).  Pass jnp.bfloat16 on
    v5e when the downstream BertOutput matmul consumes bf16 to halve HBM
    writeback bytes.
    """
    B, S, H = hidden_states.shape
    H_w, I = w.shape
    assert H_w == H, "weight must be stored as (hidden_size, intermediate_size)"
    M = B * S
    if out_dtype is None:
        out_dtype = hidden_states.dtype

    # bf16 operands prepared OUTSIDE the kernel (halves DMA bytes, no per-step
    # VPU cast inside the kernel).  Bias stays f32 for the elementwise epilogue.
    x2 = hidden_states.reshape(M, H).astype(jnp.bfloat16)
    w_bf = w.astype(jnp.bfloat16)
    b2 = b.astype(jnp.float32).reshape(1, I)

    # Row tile: sublane-aligned; ragged last tile handled by Pallas (no pad).
    tm = min(block_m, _round_up(M, 8))
    # Column tile: lane-dense multiple of 128 (512 at real BERT sizes).
    tn = _pick_col_tile(I, block_n)

    grid = (pl.cdiv(M, tm), pl.cdiv(I, tn))

    out = pl.pallas_call(
        _bert_intermediate_kernel,
        out_shape=jax.ShapeDtypeStruct((M, I), out_dtype),
        grid=grid,
        in_specs=[
            pl.BlockSpec((tm, H), lambda i, j: (i, 0)),   # activations: row tiles
            pl.BlockSpec((H, tn), lambda i, j: (0, j)),   # weight: column chunks
            pl.BlockSpec((1, tn), lambda i, j: (0, j)),   # bias: column chunks
        ],
        out_specs=pl.BlockSpec((tm, tn), lambda i, j: (i, j)),
        compiler_params=pltpu.CompilerParams(
            dimension_semantics=("parallel", "parallel"),  # megacore on v7x
            vmem_limit_bytes=64 * 1024 * 1024,
        ),
    )(x2, w_bf, b2)

    return out.reshape(B, S, I)


# ----------------------------- main -------------------------------------------
if __name__ == "__main__":
    HIDDEN = 32          # config.hidden_size (toy)
    INTERMEDIATE = 128   # config.intermediate_size = 4 * hidden (lane-dense)
    B, S = 2, 8

    key = jax.random.PRNGKey(0)
    kx, kw, kb = jax.random.split(key, 3)
    x = jax.random.normal(kx, (B, S, HIDDEN), jnp.float32)
    # stored as (in, out) == torch weight.T, so y = x @ w + b matches nn.Linear
    w = jax.random.normal(kw, (HIDDEN, INTERMEDIATE), jnp.float32) * 0.02
    b = jax.random.normal(kb, (INTERMEDIATE,), jnp.float32) * 0.02

    fwd = jax.jit(bert_intermediate)
    y = fwd(x, w, b)
    jax.block_until_ready(y)

    # plain-JAX f32 reference for the exact BertIntermediate forward
    ref = x @ w + b
    ref = ref * 0.5 * (1.0 + lax.erf(ref / jnp.float32(math.sqrt(2.0))))

    assert y.shape == (B, S, INTERMEDIATE)
    assert bool(jnp.all(jnp.isfinite(y)))
    max_err = float(jnp.max(jnp.abs(y - ref)))
    assert max_err < 1e-2, f"max abs error vs reference: {max_err}"
    print("KERNEL_OK")
</pallas_src>

<mosaic_0001>
module attributes {stable_mosaic.version = 11 : i64} {
  func.func @_bert_intermediate_kernel(%arg0: i32, %arg1: i32, %arg2: memref<16x32xbf16, #tpu.memory_space<vmem>>, %arg3: memref<32x128xbf16, #tpu.memory_space<vmem>>, %arg4: memref<1x128xf32, #tpu.memory_space<vmem>>, %arg5: memref<16x128xf32, #tpu.memory_space<vmem>>) attributes {dimension_semantics = [#tpu.dimension_semantics<parallel>, #tpu.dimension_semantics<parallel>], iteration_bounds = array<i64: 1, 1>, scalar_prefetch = 0 : i64, scratch_operands = 0 : i64, tpu.core_type = #tpu.core_type<tc>, window_params = [{transform_indices = @transform_0, window_bounds = array<i64: 16, 32>}, {transform_indices = @transform_1, window_bounds = array<i64: 32, 128>}, {transform_indices = @transform_2, window_bounds = array<i64: 1, 128>}, {transform_indices = @transform_3, window_bounds = array<i64: 16, 128>}]} {
    %c0 = arith.constant 0 : index
    %c0_0 = arith.constant 0 : index
    %0 = vector.load %arg2[%c0, %c0_0] : memref<16x32xbf16, #tpu.memory_space<vmem>>, vector<16x32xbf16>
    %c0_1 = arith.constant 0 : index
    %c0_2 = arith.constant 0 : index
    %1 = vector.load %arg3[%c0_1, %c0_2] : memref<32x128xbf16, #tpu.memory_space<vmem>>, vector<32x128xbf16>
    %cst = arith.constant dense<0.000000e+00> : vector<16x128xf32>
    %2 = tpu.matmul %0, %1, %cst {dimension_numbers = #tpu.dot_dimension_numbers<[1], [0], [0], [1], [0, 0, 1, 1], [], []>} : vector<16x32xbf16>, vector<32x128xbf16>, vector<16x128xf32> -> vector<16x128xf32>
    %c0_3 = arith.constant 0 : index
    %c0_4 = arith.constant 0 : index
    %3 = vector.load %arg4[%c0_3, %c0_4] : memref<1x128xf32, #tpu.memory_space<vmem>>, vector<1x128xf32>
    %4 = vector.broadcast %3 : vector<1x128xf32> to vector<16x128xf32>
    %5 = arith.addf %2, %4 : vector<16x128xf32>
    %cst_5 = arith.constant 5.000000e-01 : f32
    %6 = vector.broadcast %cst_5 : f32 to vector<16x128xf32>
    %7 = arith.mulf %5, %6 : vector<16x128xf32>
    %cst_6 = arith.constant 0.707106769 : f32
    %8 = vector.broadcast %cst_6 : f32 to vector<16x128xf32>
    %9 = arith.mulf %5, %8 : vector<16x128xf32>
    %10 = math.erf %9 : vector<16x128xf32>
    %cst_7 = arith.constant 1.000000e+00 : f32
    %11 = vector.broadcast %cst_7 : f32 to vector<16x128xf32>
    %12 = arith.addf %11, %10 : vector<16x128xf32>
    %13 = arith.mulf %7, %12 : vector<16x128xf32>
    %c0_8 = arith.constant 0 : index
    %c0_9 = arith.constant 0 : index
    %14 = vector.load %arg5[%c0_8, %c0_9] : memref<16x128xf32, #tpu.memory_space<vmem>>, vector<16x128xf32>
    tpu.vector_store %arg5[%c0_8, %c0_9], %13 {strides = array<i32>} : memref<16x128xf32, #tpu.memory_space<vmem>>, vector<16x128xf32>,
    return
  }
  func.func @transform_0(%arg0: i32, %arg1: i32) -> (i32, i32) {
    %c0_i32 = arith.constant 0 : i32
    %c0_i32_0 = arith.constant 0 : i32
    return %arg0, %c0_i32 : i32, i32
  }
  func.func @transform_1(%arg0: i32, %arg1: i32) -> (i32, i32) {
    %c0_i32 = arith.constant 0 : i32
    %c0_i32_0 = arith.constant 0 : i32
    return %c0_i32, %arg1 : i32, i32
  }
  func.func @transform_2(%arg0: i32, %arg1: i32) -> (i32, i32) {
    %c0_i32 = arith.constant 0 : i32
    %c0_i32_0 = arith.constant 0 : i32
    return %c0_i32, %arg1 : i32, i32
  }
  func.func @transform_3(%arg0: i32, %arg1: i32) -> (i32, i32) {
    %c0_i32 = arith.constant 0 : i32
    return %arg0, %arg1 : i32, i32
  }
}

</mosaic_0001>

<bundles_post_ra>
// kernel: bert_intermediate.1
= control target key start
LH: loop header
LB: loop body
LE: loop exit
PB: predicated region body
PF: predicated region fallthrough
CT: control target
= control target key end

     0   :  { %s272_s0 = inlined_call_operand.vmem [shape: bf16[16,32], index: 0, kind: input, shape index: {}]   ;;  %s273_s1 = inlined_call_operand.vmem [shape: bf16[32,128], index: 1, kind: input, shape index: {}]   ;;  %s274_s2 = inlined_call_operand.vmem [shape: f32[1,128], index: 2, kind: input, shape index: {}]   ;;  %s275_s3 = inlined_call_operand.hbm [shape: f32[16,128], index: 3, kind: output, shape index: {}]  }
   0x1   :  { %v186_v0 = vld [vmem:[%s273_s1 + $0x8] sm:$0xff] }
   0x2   :  { %8 = vsyncpa [#allocation3], 0  ;;  %53 = vmatpush.bf16.msra.mxu0 %v186_v0  ;;  %v185_v1 = vld [vmem:[%s273_s1] sm:$0xff]  ;;  %vm43_vm0 = vcmask 261120   ;;  %s157_s21 = sshll.u32 %s275_s3, 4  ;;  %s222_s22 = smov 128   ;;  %s158_s21 = int_to_ptr.hbm [resolvable:$true] %s157_s21 }
   0x3   :  { %v184_v2 = vld [vmem:[%s272_s0] sm:$0xff]  ;;  %s221_s0 = smov [#allocation2]   ;;  %s223_s23 = smov 8  }
   0x4   :  { %v190_v3 = vld [vmem:[%s274_s2] ss:$0 sm:$0xff]  ;;  %s155_s1 = sshll.u32 %s221_s0, 4  ;;  %s156_s1 = int_to_ptr.vmem [resolvable:$true] %s155_s1 }
   0x6   :  { %54 = vmatpush.bf16.msra.mxu0 %v185_v1 }
   0x9   :  { %181 = vmatmul.msk.bf16.vlgmr.msra.gmra.mxu0 %vm43_vm0, %v184_v2 }
  0x86   :  { %v56_v4 = vpop.f32.mrf.mxu0 }
  0x87   :  { %v256_v5 = vadd.f32 %v190_v3, %v56_v4 }
  0x89   :  { %v63_v6 = vmul.f32 0.70710677, %v256_v5 }
  0x8b   :  { %v65_v7 = vmul.f32 %v63_v6, %v63_v6 }
  0x8d   :  { %v66_v8 = vmin.f32 %v65_v7, 16.0 }
  0x8e   :  { %v58_v9 = vpop.f32.mrf.mxu0 }
  0x8f   :  { %v67_v10 = vmul.f32 2.1237322e-06, %v66_v8  ;;  %v78_v11 = vmul.f32 3.8918573e-05, %v66_v8  ;;  %v259_v12 = vadd.f32 %v190_v3, %v58_v9 }
  0x91   :  { %v68_v13 = vadd.f32 0.00028619796, %v67_v10  ;;  %v79_v14 = vadd.f32 0.001143296, %v78_v11  ;;  %v262_v15 = vmul.f32 0.70710677, %v259_v12 }
  0x92   :  { %v61_v11 = vmul.f32 0.5, %v256_v5  ;;  %v62_v5 = vmul.f32 0.5, %v259_v12 }
  0x93   :  { %v69_v16 = vmul.f32 %v68_v13, %v66_v8  ;;  %v80_v17 = vmul.f32 %v79_v14, %v66_v8  ;;  %v105_v18 = vmul.f32 %v262_v15, %v262_v15 }
  0x95   :  { %v81_v19 = vadd.f32 0.014752088, %v80_v17  ;;  %v70_v20 = vadd.f32 0.0036580483, %v69_v16  ;;  %v106_v21 = vmin.f32 %v105_v18, 16.0 }
  0x97   :  { %v82_v22 = vmul.f32 %v81_v19, %v66_v8  ;;  %v107_v23 = vmul.f32 2.1237322e-06, %v106_v21  ;;  %v118_v24 = vmul.f32 3.8918573e-05, %v106_v21  ;;  %v71_v26 = vmul.f32 %v70_v20, %v66_v8 }
  0x99   :  { %v83_v25 = vadd.f32 0.112945676, %v82_v22  ;;  %v108_v27 = vadd.f32 0.00028619796, %v107_v23  ;;  %v119_v28 = vadd.f32 0.001143296, %v118_v24 }
  0x9a   :  { %v72_v33 = vadd.f32 0.05243302, %v71_v26 }
  0x9b   :  { %v84_v29 = vmul.f32 %v83_v25, %v66_v8  ;;  %v109_v30 = vmul.f32 %v108_v27, %v106_v21  ;;  %v120_v31 = vmul.f32 %v119_v28, %v106_v21 }
  0x9c   :  { %v73_v39 = vmul.f32 %v72_v33, %v66_v8 }
  0x9d   :  { %v85_v32 = vadd.f32 0.4994258, %v84_v29  ;;  %v121_v34 = vadd.f32 0.014752088, %v120_v31  ;;  %v110_v36 = vadd.f32 0.0036580483, %v109_v30 }
  0x9e   :  { %v74_v43 = vadd.f32 0.18741608, %v73_v39 }
  0x9f   :  { %v86_v35 = vmul.f32 %v85_v32, %v66_v8  ;;  %v122_v37 = vmul.f32 %v121_v34, %v106_v21  ;;  %v111_v41 = vmul.f32 %v110_v36, %v106_v21 }
  0xa0   :  { %v75_v48 = vmul.f32 %v74_v43, %v66_v8 }
  0xa1   :  { %v87_v38 = vadd.f32 1.0, %v86_v35  ;;  %v123_v40 = vadd.f32 0.112945676, %v122_v37  ;;  %v112_v45 = vadd.f32 0.05243302, %v111_v41 }
  0xa2   :  { %v76_v54 = vadd.f32 1.1283791, %v75_v48 }
  0xa3   :  { %191 = vrcp.f32 %v87_v38  ;;  %v124_v42 = vmul.f32 %v123_v40, %v106_v21  ;;  %v113_v51 = vmul.f32 %v112_v45, %v106_v21  ;;  %v99_v53 = vand.u32 2147483648, %v87_v38 }
  0xa4   :  { %v97_v56 = vand.u32 2147483647, %v87_v38  ;;  %vm93_vm2 = vweird.f32 %v87_v38  ;;  %v77_v61 = vmul.f32 %v76_v54, %v63_v6 }
  0xa5   :  { %v125_v44 = vadd.f32 0.4994258, %v124_v42  ;;  %v114_v57 = vadd.f32 0.18741608, %v113_v51  ;;  %v100_v59 = vor.u32 1.1754944e-38, %v99_v53 }
  0xa6   :  { %vm98_vm4 = vcmp.eq.f32.partialorder %v97_v56, 8.507059e+37 }
  0xa7   :  { %v126_v46 = vmul.f32 %v125_v44, %v106_v21  ;;  %v115_v0 = vmul.f32 %v114_v57, %v106_v21 }
  0xa9   :  { %v192_v47 = vpop.eup %191  ;;  %v127_v50 = vadd.f32 1.0, %v126_v46  ;;  %v116_v8 = vadd.f32 1.1283791, %v115_v0 }
  0xaa   :  { %v89_v49 = vmul.f32 %v192_v47, %v87_v38  ;;  %vm94_vm1 = vweird.f32 %v192_v47 }
  0xab   :  { %193 = vrcp.f32 %v127_v50  ;;  %vm95_vm3 = vmor %vm93_vm2, %vm94_vm1  ;;  %v139_v7 = vand.u32 2147483648, %v127_v50  ;;  %v137_v10 = vand.u32 2147483647, %v127_v50  ;;  %vm133_vm6 = vweird.f32 %v127_v50 }
  0xac   :  { %v90_v52 = vsub.f32 1.0, %v89_v49  ;;  %v117_v17 = vmul.f32 %v116_v8, %v262_v15 }
  0xad   :  { %v140_v6 = vor.u32 1.1754944e-38, %v139_v7  ;;  %vm138_vm8 = vcmp.eq.f32.partialorder %v137_v10, 8.507059e+37 }
  0xae   :  { %v91_v55 = vmul.f32 %v192_v47, %v90_v52 }
  0xb0   :  { %v92_v58 = vadd.f32 %v192_v47, %v91_v55 }
  0xb1   :  { %v194_v60 = vpop.eup %193 }
  0xb2   :  { %v96_v62 = vsel %vm95_vm3, %v192_v47, %v92_v58  ;;  %v129_v1 = vmul.f32 %v194_v60, %v127_v50  ;;  %vm134_vm5 = vweird.f32 %v194_v60 }
  0xb3   :  { %v101_v63 = vsel %vm98_vm4, %v100_v59, %v96_v62  ;;  %vm135_vm7 = vmor %vm133_vm6, %vm134_vm5 }
  0xb4   :  { %v102_v2 = vmul.f32 %v101_v63, %v77_v61  ;;  %v130_v3 = vsub.f32 1.0, %v129_v1 }
  0xb6   :  { %v182_v4 = vclamps-f32 %v102_v2, 1.0  ;;  %v131_v9 = vmul.f32 %v194_v60, %v130_v3 }
  0xb8   :  { %v145_v13 = vadd.f32 1.0, %v182_v4  ;;  %v132_v14 = vadd.f32 %v194_v60, %v131_v9 }
  0xba   :  { %v147_v16 = vmul.f32 %v145_v13, %v61_v11  ;;  %v136_v18 = vsel %vm135_vm7, %v194_v60, %v132_v14 }
  0xbb   :  { %v141_v19 = vsel %vm138_vm8, %v140_v6, %v136_v18 }
  0xbc   :  { %149 = vst [vmem:[#allocation2] sm:$0xff] %v147_v16  ;;  %v142_v20 = vmul.f32 %v141_v19, %v117_v17 }
  0xbe   :  { %v183_v21 = vclamps-f32 %v142_v20, 1.0 }
  0xc0   :  { %v146_v22 = vadd.f32 1.0, %v183_v21 }
  0xc2   :  { %v148_v23 = vmul.f32 %v146_v22, %v62_v5 }
  0xc4   :  { %150 = vst [vmem:[#allocation2 + $0x8] sm:$0xff] %v148_v23 }
  0xc5   :  { %163 = dma.vmem_to_hbm [thread:$0]  %s156_s1, 256, %s158_s21, [#allocation3], %s222_s22, %s222_s22, %s223_s23  }
  0xc6   :  { %219 = dma.done.wait [#allocation3], 256  }
  0xc7   :  { %220 = vsyncadd [#allocation3], 4294967040 }
  0xc8   :  { %168 = vsyncpa [#allocation3], 1 }

</bundles_post_ra>
